<compile_context>
chip_gen: v7x
topology: tpu7x:2x2x1
jax: 0.10.0
libtpu: 0.0.40
codegen_flags: <defaults>
</compile_context>

<pallas_src>
import functools

import jax
import jax.numpy as jnp
from jax.experimental import pallas as pl
from jax.experimental.pallas import tpu as pltpu


def _subpixel_kernel(x_ref, o_ref, *, r):
    # x_ref: (rt*r, lt)  ->  o_ref: (rt, lt*r)
    # out[o, l*r + j] = x[o*r + j, l]
    x = x_ref[...]
    rows_in, lt = x.shape
    rows_out = rows_in // r
    y = x.reshape(rows_out, r, lt)       # [o, j, l] = x[o*r + j, l]
    y = jnp.transpose(y, (0, 2, 1))      # [o, l, j]
    o_ref[...] = y.reshape(rows_out, lt * r)


def _choose_tiles(rows_out, l, r, itemsize):
    """Pick (row_tile, lane_tile) for the flattened (N*C//r, L*r) output."""
    # Sublane alignment for the second-to-last block dim (f32: 8, bf16: 16,
    # int8/fp8: 32).  Input block rows = rt*r keep the same alignment.
    if itemsize >= 4:
        sub = 8
    elif itemsize == 2:
        sub = 16
    else:
        sub = 32

    # Lane tile: largest multiple of 128 up to 1024 (measured ~85% of HBM
    # roofline at 512-1024); full extent when L < 128 (always a legal block).
    if l >= 128:
        lt = min(1024, (l // 128) * 128)
    else:
        lt = l

    # Byte budget per block: ~2 MiB.  Input block and output block are the
    # same size and both get double-buffered -> ~4x block bytes total
    # (~8 MiB), within scoped-VMEM defaults on v5e/v6e/v7x.
    budget_bytes = 2 * 1024 * 1024
    max_rows = max(sub, budget_bytes // max(1, lt * r * itemsize))

    if rows_out <= sub:
        rt = rows_out                          # full extent (always legal)
    else:
        rt = min(rows_out, max_rows)
        rt = max(sub, (rt // sub) * sub)       # multiple of sublane count
    return rt, lt


def subpixel_forward(x, r):
    """Pallas forward of the PyTorch Subpixel module. x: (N, C, L)."""
    n, c, l = x.shape
    assert c % r == 0
    c2 = c // r
    rows_in = n * c
    rows_out = n * c2
    itemsize = jnp.dtype(x.dtype).itemsize

    rt, lt = _choose_tiles(rows_out, l, r, itemsize)
    grid = (pl.cdiv(rows_out, rt), pl.cdiv(l, lt))

    # Free, contiguous reshape: (N, C, L) -> (N*C, L).
    x2 = x.reshape(rows_in, l)

    out2 = pl.pallas_call(
        functools.partial(_subpixel_kernel, r=r),
        out_shape=jax.ShapeDtypeStruct((rows_out, l * r), x.dtype),
        grid_spec=pltpu.PrefetchScalarGridSpec(
            num_scalar_prefetch=0,
            grid=grid,
            # Output row block bi covers rows [bi*rt, bi*rt+rt); the matching
            # input rows are [bi*rt*r, bi*rt*r + rt*r)  (input row = r*o + j),
            # i.e. input block index bi with block rows rt*r.
            in_specs=[pl.BlockSpec((rt * r, lt), lambda bi, li: (bi, li))],
            out_specs=pl.BlockSpec((rt, lt * r), lambda bi, li: (bi, li)),
        ),
        compiler_params=pltpu.CompilerParams(
            dimension_semantics=("parallel", "parallel")),
        cost_estimate=pl.CostEstimate(
            flops=0,
            transcendentals=0,
            bytes_accessed=2 * n * c * l * itemsize),
    )(x2)

    # Free, contiguous reshape back: (N*C//r, L*r) -> (N, C//r, L*r).
    return out2.reshape(n, c2, l * r)


def reference_subpixel(x, r):
    """Pure-JAX mirror of the PyTorch Subpixel.forward."""
    n, c, l = x.shape
    return (x.reshape(n, c // r, r, l)
             .transpose(0, 1, 3, 2)
             .reshape(n, c // r, l * r))


if __name__ == "__main__":
    N, C, L = 2, 4, 16
    r_subpixel = 2

    key = jax.random.PRNGKey(0)
    x = jax.random.normal(key, (N, C, L), jnp.float32)

    fwd = jax.jit(functools.partial(subpixel_forward, r=r_subpixel))
    out = fwd(x)
    jax.block_until_ready(out)

    ref = reference_subpixel(x, r_subpixel)
    assert out.shape == (N, C // r_subpixel, L * r_subpixel), out.shape
    assert jnp.array_equal(out, ref), "mismatch vs reference"
    print("KERNEL_OK")
</pallas_src>

<mosaic_0001>
module attributes {stable_mosaic.version = 11 : i64} {
  func.func @_subpixel_kernel(%arg0: i32, %arg1: i32, %arg2: memref<8x16xf32, #tpu.memory_space<vmem>>, %arg3: memref<4x32xf32, #tpu.memory_space<vmem>>) attributes {dimension_semantics = [#tpu.dimension_semantics<parallel>, #tpu.dimension_semantics<parallel>], iteration_bounds = array<i64: 1, 1>, scalar_prefetch = 0 : i64, scratch_operands = 0 : i64, tpu.core_type = #tpu.core_type<tc>, window_params = [{transform_indices = @transform_0, window_bounds = array<i64: 8, 16>}, {transform_indices = @transform_1, window_bounds = array<i64: 4, 32>}]} {
    %c0 = arith.constant 0 : index
    %c0_0 = arith.constant 0 : index
    %0 = vector.load %arg2[%c0, %c0_0] : memref<8x16xf32, #tpu.memory_space<vmem>>, vector<8x16xf32>
    %1 = vector.shape_cast %0 : vector<8x16xf32> to vector<4x2x16xf32>
    %2 = tpu.transpose %1, [0, 2, 1] : vector<4x2x16xf32> -> vector<4x16x2xf32>
    %3 = vector.shape_cast %2 : vector<4x16x2xf32> to vector<4x32xf32>
    %c0_1 = arith.constant 0 : index
    %c0_2 = arith.constant 0 : index
    %4 = vector.load %arg3[%c0_1, %c0_2] : memref<4x32xf32, #tpu.memory_space<vmem>>, vector<4x32xf32>
    tpu.vector_store %arg3[%c0_1, %c0_2], %3 {strides = array<i32>} : memref<4x32xf32, #tpu.memory_space<vmem>>, vector<4x32xf32>,
    return
  }
  func.func @transform_0(%arg0: i32, %arg1: i32) -> (i32, i32) {
    %c0_i32 = arith.constant 0 : i32
    return %arg0, %arg1 : i32, i32
  }
  func.func @transform_1(%arg0: i32, %arg1: i32) -> (i32, i32) {
    %c0_i32 = arith.constant 0 : i32
    return %arg0, %arg1 : i32, i32
  }
}

</mosaic_0001>

<bundles_post_ra>
// kernel: subpixel_forward.1
= control target key start
LH: loop header
LB: loop body
LE: loop exit
PB: predicated region body
PF: predicated region fallthrough
CT: control target
= control target key end

     0   :  { %6 = vsyncpa [#allocation3], 0  ;;  %s538_s0 = inlined_call_operand.hbm [shape: f32[8,16], index: 0, kind: input, shape index: {}]   ;;  %s539_s1 = inlined_call_operand.hbm [shape: f32[4,32], index: 1, kind: output, shape index: {}]  }
   0x1   :  { %7 = vsyncpa [#allocation4], 0  ;;  %s484_s6 = smov [#allocation2]   ;;  %s436_s10 = scalar_lea.hbm %s538_s0, 128 }
   0x2   :  { %s14_s7 = sshll.u32 %s484_s6, 4  ;;  %p437_p0 = scmp.ne.s32.totalorder %s538_s0, %s436_s10  ;;  %s15_s7 = int_to_ptr.vmem [resolvable:$true] %s14_s7 }
   0x3   :  { %p440_p1 = scmp.lt.u32.totalorder %s436_s10, %s538_s0 }
   0x5   :  { %p442_p2 = pnand %p440_p1, %p437_p0 }
   0x7   :  { %445 = shalt.err (!%p442_p2)
}
   0x8   :  { %s446_s15 = scalar_lea.vmem %s15_s7, 128  ;;  %p451_p4 = scmp.lt.s32.totalorder %s15_s7, %s15_s7 }
   0x9   :  { %p447_p3 = scmp.ne.s32.totalorder %s15_s7, %s446_s15  ;;  %p452_p5 = scmp.lt.s32.totalorder %s446_s15, %s446_s15 }
   0xb   :  { %p453_p6 = por %p452_p5, %p451_p4 }
   0xd   :  { %p454_p7 = pnand %p453_p6, %p447_p3 }
   0xf   :  { %457 = shalt.err (!%p454_p7)
}
  0x10   :  { %17 = dma.hbm_to_vmem [thread:$0]  %s538_s0, 128, %s15_s7, [#allocation3]  }
  0x11   :  { %480 = dma.done.wait [#allocation3], 128  }
  0x12   :  { %481 = vsyncadd [#allocation3], 4294967168  ;;  %v27_v0 = vlaneseq  ;;  %v485_v1 = vmov 1983009808   ;;  %v21_v6 = vld [vmem:[#allocation2] sm:$0xff]  ;;  %s487_s0 = smov 12  }
  0x13   :  { %v25_v2 = vunpack.c.l.s4 %v485_v1  ;;  %v23_v8 = vcombine.high %v21_v6, %v21_v6  ;;  %v486_v15 = vmov 1934713408   ;;  %s488_s18 = smov 4   ;;  %v489_v46 = vmov 0.0   ;;  %s490_s19 = smov 8  }
  0x14   :  { %v28_v3 = vshrl.u32 %v27_v0, 7  ;;  %v207_v16 = vunpack.c.l.s4 %v486_v15  ;;  %s491_s20 = smov 2   ;;  %s492_s21 = smov 6   ;;  %vm368_vm0 = vcmask 15360   ;;  %vm370_vm1 = vcmask 31744  }
  0x15   :  { %v26_v4 = vunpack.c.0.s8 %v25_v2  ;;  %s493_s22 = smov 16   ;;  %s494_s23 = smov 10   ;;  %vm372_vm2 = vcmask 48128   ;;  %vm374_vm3 = vcmask 64512   ;;  %vm376_vm4 = vcmask 80896  }
  0x16   :  { %v208_v19 = vunpack.c.0.s8 %v207_v16  ;;  %s495_s24 = smov 20   ;;  %s496_s25 = smov 14   ;;  %vm378_vm5 = vcmask 97280   ;;  %vm380_vm6 = vcmask 113664   ;;  %vm382_vm7 = vcmask 130048  }
  0x17   :  { %v29_v5 = vsub.s32 %v26_v4, %v28_v3  ;;  %s497_s26 = smov 24   ;;  %s498_s27 = smov 28   ;;  %vm384_vm8 = vcmask 146432   ;;  %vm386_vm9 = vcmask 162816   ;;  %vm388_vm10 = vcmask 179200  }
  0x18   :  { %v211_v25 = vsub.s32 %v208_v19, %v28_v3  ;;  %s499_s28 = smov 18   ;;  %s500_s29 = smov 22   ;;  %vm390_vm11 = vcmask 195584   ;;  %vm392_vm12 = vcmask 211968   ;;  %vm394_vm13 = vcmask 228352  }
  0x19   :  { %v30_v7 = vrot.slane %v21_v6, %v29_v5  ;;  %v37_v9 = vrot.slane %v23_v8, %v29_v5  ;;  %s501_s30 = smov 26   ;;  %s502_s2 = smov 30   ;;  %vm396_vm14 = vcmask 244736   ;;  %vm398_vm15 = vcmask 257024  }
  0x1a   :  { %s503_s3 = smov [#allocation5]  }
  0x1b   :  { %44 = vxpose.xlu0.b32.start.end [1/1] (short) (narrow) %v30_v7, 16  ;;  %v38_v10 = vcombine.high %v30_v7, %v30_v7  ;;  %108 = vxpose.xlu1.b32.start.end [1/1] (short) (narrow) %v37_v9, 16  ;;  %v39_v11 = vcombine.high %v37_v9, %v37_v9  ;;  %s406_s4 = sshll.u32 %s503_s3, 4  ;;  %s407_s4 = int_to_ptr.vmem [resolvable:$true] %s406_s4 }
  0x1c   :  { %s458_s5 = scalar_lea.vmem %s407_s4, 64  ;;  %p463_p9 = scmp.lt.s32.totalorder %s407_s4, %s407_s4 }
  0x1d   :  { %p459_p8 = scmp.ne.s32.totalorder %s407_s4, %s458_s5  ;;  %p464_p10 = scmp.lt.s32.totalorder %s458_s5, %s458_s5 }
  0x1f   :  { %p465_p11 = por %p464_p10, %p463_p9 }
  0x20   :  { %76 = vxpose.xlu0.b32.start.end [1/1] (short) (narrow) %v38_v10, 16  ;;  %140 = vxpose.xlu1.b32.start.end [1/1] (short) (narrow) %v39_v11, 16 }
  0x21   :  { %p466_p12 = pnand %p465_p11, %p459_p8 }
  0x9b   :  { %v60_v12 = vpop.trf.xlu0  ;;  %v124_v13 = vpop.trf.xlu1 }
  0x9c   :  { %v172_v20 = vcombine.low %v60_v12, %v124_v13  ;;  %v173_v21 = vcombine.high %v60_v12, %v124_v13 }
  0x9e   :  { %v180_v26 = vrot.slane %v172_v20, %v29_v5  ;;  %v187_v27 = vrot.slane %v173_v21, %v29_v5 }
  0x9f   :  { %v61_v14 = vpop.trf.xlu0  ;;  %v125_v17 = vpop.trf.xlu1 }
  0xa0   :  { %v240_v32 = vcombine.low %v61_v14, %v125_v17  ;;  %v241_v48 = vcombine.high %v61_v14, %v125_v17 }
  0xa2   :  { %v248_v42 = vrot.slane %v240_v32, %v29_v5  ;;  %v255_v53 = vrot.slane %v241_v48, %v29_v5 }
  0xa3   :  { %v92_v18 = vpop.trf.xlu0  ;;  %v156_v22 = vpop.trf.xlu1 }
  0xa4   :  { %v188_v23 = vcombine.low %v92_v18, %v156_v22  ;;  %v189_v24 = vcombine.high %v92_v18, %v156_v22 }
  0xa6   :  { %v196_v28 = vrot.slane %v188_v23, %v29_v5  ;;  %v203_v29 = vrot.slane %v189_v24, %v29_v5 }
  0xa7   :  { %v93_v30 = vpop.trf.xlu0  ;;  %v157_v31 = vpop.trf.xlu1 }
  0xa8   :  { %v204_v33 = vcombine.low %v180_v26, %v196_v28  ;;  %v205_v34 = vcombine.high %v180_v26, %v196_v28  ;;  %v221_v35 = vcombine.high %v187_v27, %v203_v29  ;;  %v256_v36 = vcombine.low %v93_v30, %v157_v31 }
  0xa9   :  { %v220_v37 = vcombine.low %v187_v27, %v203_v29  ;;  %v257_v43 = vcombine.high %v93_v30, %v157_v31 }
  0xaa   :  { %v235_v38 = vrot.slane %v221_v35, %v211_v25  ;;  %v219_v39 = vrot.slane %v205_v34, %v211_v25  ;;  %v212_v40 = vrot.slane %v204_v33, %v211_v25  ;;  %v264_v41 = vrot.slane %v256_v36, %v29_v5 }
  0xab   :  { %v228_v45 = vrot.slane %v220_v37, %v211_v25  ;;  %v271_v49 = vrot.slane %v257_v43, %v29_v5 }
  0xac   :  { %329 = vrot.lane.b32.xlu0 %v235_v38, %s487_s0  ;;  %313 = vrot.lane.b32.xlu1 %v219_v39, %s488_s18  ;;  %v272_v44 = vcombine.low %v248_v42, %v264_v41  ;;  %v236_v47 = vcombine.high %v212_v40, %v489_v46  ;;  %v273_v50 = vcombine.high %v248_v42, %v264_v41 }
  0xad   :  { %v237_v51 = vcombine.high %v219_v39, %v489_v46  ;;  %v288_v54 = vcombine.low %v255_v53, %v271_v49  ;;  %v238_v55 = vcombine.high %v228_v45, %v489_v46  ;;  %v289_v57 = vcombine.high %v255_v53, %v271_v49 }
  0xae   :  { %v280_v52 = vrot.slane %v272_v44, %v211_v25  ;;  %v287_v56 = vrot.slane %v273_v50, %v211_v25  ;;  %v239_v58 = vcombine.high %v235_v38, %v489_v46 }
  0xaf   :  { %v296_v59 = vrot.slane %v288_v54, %v211_v25  ;;  %v303_v60 = vrot.slane %v289_v57, %v211_v25 }
  0xb0   :  { %321 = vrot.lane.b32.xlu1 %v228_v45, %s490_s19  ;;  %309 = vrot.lane.b32.xlu0 %v236_v47, %s491_s20  ;;  %v304_v61 = vcombine.high %v280_v52, %v489_v46  ;;  %v305_v62 = vcombine.high %v287_v56, %v489_v46 }
  0xb1   :  { %v306_v63 = vcombine.high %v296_v59, %v489_v46  ;;  %v307_v0 = vcombine.high %v303_v60, %v489_v46 }
  0xb4   :  { %317 = vrot.lane.b32.xlu1 %v237_v51, %s492_s21  ;;  %337 = vrot.lane.b32.xlu0 %v280_v52, %s493_s22 }
  0xb8   :  { %325 = vrot.lane.b32.xlu1 %v238_v55, %s494_s23  ;;  %345 = vrot.lane.b32.xlu0 %v287_v56, %s495_s24 }
  0xbc   :  { %333 = vrot.lane.b32.xlu1 %v239_v58, %s496_s25  ;;  %353 = vrot.lane.b32.xlu0 %v296_v59, %s497_s26 }
  0xc0   :  { %361 = vrot.lane.b32.xlu0 %v303_v60, %s498_s27  ;;  %341 = vrot.lane.b32.xlu1 %v304_v61, %s499_s28 }
  0xc4   :  { %349 = vrot.lane.b32.xlu1 %v305_v62, %s500_s29 }
  0xc8   :  { %357 = vrot.lane.b32.xlu1 %v306_v63, %s501_s30 }
  0xcc   :  { %365 = vrot.lane.b32.xlu1 %v307_v0, %s502_s2 }
 0x11e   :  { %v330_v1 = vpop.permute.xlu0 %329  ;;  %v314_v2 = vpop.permute.xlu1 %313 }
 0x122   :  { %v310_v3 = vpop.permute.xlu0 %309  ;;  %v322_v4 = vpop.permute.xlu1 %321 }
 0x123   :  { %v369_v5 = vsel %vm368_vm0, %v212_v40, %v310_v3 }
 0x124   :  { %v371_v6 = vsel %vm370_vm1, %v369_v5, %v314_v2 }
 0x126   :  { %v318_v7 = vpop.permute.xlu1 %317  ;;  %v338_v11 = vpop.permute.xlu0 %337 }
 0x127   :  { %v373_v8 = vsel %vm372_vm2, %v371_v6, %v318_v7 }
 0x128   :  { %v375_v9 = vsel %vm374_vm3, %v373_v8, %v322_v4 }
 0x12a   :  { %v326_v10 = vpop.permute.xlu1 %325  ;;  %v346_v16 = vpop.permute.xlu0 %345 }
 0x12b   :  { %v377_v12 = vsel %vm376_vm4, %v375_v9, %v326_v10 }
 0x12c   :  { %v379_v13 = vsel %vm378_vm5, %v377_v12, %v330_v1 }
 0x12e   :  { %v334_v14 = vpop.permute.xlu1 %333  ;;  %v354_v22 = vpop.permute.xlu0 %353 }
 0x12f   :  { %v381_v15 = vsel %vm380_vm6, %v379_v13, %v334_v14 }
 0x130   :  { %v383_v17 = vsel %vm382_vm7, %v381_v15, %v338_v11 }
 0x132   :  { %v342_v18 = vpop.permute.xlu1 %341  ;;  %v362_v27 = vpop.permute.xlu0 %361 }
 0x133   :  { %v385_v19 = vsel %vm384_vm8, %v383_v17, %v342_v18 }
 0x134   :  { %v387_v20 = vsel %vm386_vm9, %v385_v19, %v346_v16 }
 0x136   :  { %v350_v21 = vpop.permute.xlu1 %349 }
 0x137   :  { %v389_v23 = vsel %vm388_vm10, %v387_v20, %v350_v21 }
 0x138   :  { %v391_v24 = vsel %vm390_vm11, %v389_v23, %v354_v22 }
 0x13a   :  { %v358_v25 = vpop.permute.xlu1 %357 }
 0x13b   :  { %v393_v26 = vsel %vm392_vm12, %v391_v24, %v358_v25 }
 0x13c   :  { %v395_v28 = vsel %vm394_vm13, %v393_v26, %v362_v27 }
 0x13e   :  { %v366_v29 = vpop.permute.xlu1 %365 }
 0x13f   :  { %v397_v30 = vsel %vm396_vm14, %v395_v28, %v366_v29 }
 0x140   :  { %399 = vst.msk [vmem:[#allocation5] sm:$0xf] %vm398_vm15, %v397_v30 }
 0x141   :  { %469 = shalt.err (!%p466_p12)
}
 0x142   :  { %s470_s8 = scalar_lea.hbm %s539_s1, 64 }
 0x143   :  { %p471_p13 = scmp.ne.s32.totalorder %s539_s1, %s470_s8  ;;  %p474_p0 = scmp.lt.u32.totalorder %s470_s8, %s539_s1 }
 0x145   :  { %p476_p1 = pnand %p474_p0, %p471_p13 }
 0x147   :  { %479 = shalt.err (!%p476_p1)
}
 0x148   :  { %409 = dma.vmem_to_hbm [thread:$0]  %s407_s4, 64, %s539_s1, [#allocation4]  }
 0x149   :  { %482 = dma.done.wait [#allocation4], 64  }
 0x14a   :  { %483 = vsyncadd [#allocation4], 4294967232 }
 0x14b   :  { %413 = vsyncpa [#allocation3], 1 }
 0x14c   :  { %414 = vsyncpa [#allocation4], 1 }

</bundles_post_ra>
